<compile_context>
chip_gen: v7x
topology: tpu7x:2x2x1
jax: 0.10.0
libtpu: 0.0.40
codegen_flags: <defaults>
</compile_context>

<pallas_src>
import functools

import jax
import jax.numpy as jnp
from jax.experimental import pallas as pl
from jax.experimental.pallas import tpu as pltpu


def _round_up(x, m):
    return ((x + m - 1) // m) * m


# ----------------------------------------------------------------------------
# Fused Pallas kernel: dilated conv stack (k=2, ReLU) + linear head.
# ----------------------------------------------------------------------------
def _tcnn_fused_kernel(x_ref, w_ref, b_ref, lw_ref, lb_ref, out_ref,
                       buf0, buf1, *, dils, lens, cins, couts, origin):
    """One batch-tile of the full TCNN forward.

    x_ref : (bt, l_buf, c_pad)       host-staged level-0 activation (zeros
                                     outside rows [P, P+L) / lanes [0, c_in))
    w_ref : (2*n_levels, c_pad, c_pad)  packed conv weights, taps kept separate
    b_ref : (n_levels, 1, c_pad)     packed conv biases (f32)
    lw_ref: (c_pad, O)               linear weight (channel-padded rows)
    lb_ref: (1, O)                   linear bias (f32)
    out_ref:(bt, 1, O)
    buf0/buf1: (bt, l_buf, c_pad)    ping-pong activation scratch (buf1 is a
                                     stub when < 3 levels).
    Layout invariant: every level's valid data lives at time rows [P, P+len),
    left pad [P-d, P) and right pad [P+len, P+len+d) are zero.
    """
    n_levels = len(dils)
    P = origin
    bt, l_buf, c_pad = x_ref.shape
    act_dt = x_ref.dtype
    bufs = (buf0, buf1)

    # Left-pad rows [0, P) of any scratch buffer that is read must be zero.
    # They are never written by the slab stores below, so a tiny per-step zero
    # keeps the invariant with no cross-grid-step scratch state (safe when the
    # "parallel" batch axis is split across v7x's two TensorCores).
    if n_levels >= 2:
        buf0[:, 0:P, :] = jnp.zeros((bt, P, buf0.shape[-1]), act_dt)
    if n_levels >= 3:
        buf1[:, 0:P, :] = jnp.zeros((bt, P, buf1.shape[-1]), act_dt)

    cur = x_ref                      # level-0 activation comes straight from the input block
    for i, d in enumerate(dils):
        cin, cout = cins[i], couts[i]
        li = lens[i]                 # valid input length of this level
        w0 = w_ref[2 * i, :cin, :cout]       # tap-0 weight
        w1 = w_ref[2 * i + 1, :cin, :cout]   # tap-1 weight
        bi = b_ref[i, :, :cout]              # (1, cout) f32

        if i < n_levels - 1:
            lo = li + d                      # valid output length
            lo8 = _round_up(lo, 8)           # 8-rounded slab (few extra garbage rows)
            # Two accumulating MXU matmuls over the flattened slab (no concat).
            # The reshape is a free relabeling: lo8 % 8 == 0, lanes % 128 == 0.
            x1 = cur[:, P:P + lo8, :cin].reshape(bt * lo8, cin)           # aligned
            x0 = cur[:, P - d:P - d + lo8, :cin].reshape(bt * lo8, cin)   # offset by d
            y = (jnp.dot(x0, w0, preferred_element_type=jnp.float32)
                 + jnp.dot(x1, w1, preferred_element_type=jnp.float32))
            y = jnp.maximum(y + bi, 0.0)     # bias + ReLU in f32; dropout = identity
            nxt = bufs[i % 2]
            # Single aligned lane-dense slab store of the whole level output.
            nxt[:, P:P + lo8, :cout] = y.reshape(bt, lo8, cout).astype(act_dt)
            d_next = dils[i + 1]
            if i + 1 < n_levels - 1:
                # Right-pad rows the next level's tap-1 reads: rows past the
                # valid length may hold rounded-up-store garbage or stale data.
                nxt[:, P + lo:P + lo + d_next, :cout] = jnp.zeros(
                    (bt, d_next, cout), act_dt)
            cur = nxt
        else:
            # Final level: only the last time step feeds the linear head and its
            # second tap always reads right padding (zeros), so
            #   y_last = relu(x[:, -1, :] @ W_tap0 + b);  out = y_last @ W_lin + b_lin
            x_last = cur[:, P + li - 1, :cin]                        # (bt, cin)
            y_last = jnp.maximum(
                jnp.dot(x_last, w0, preferred_element_type=jnp.float32) + bi, 0.0)
            lw = lw_ref[:cout, :]
            out = jnp.dot(y_last.astype(lw.dtype), lw,
                          preferred_element_type=jnp.float32) + lb_ref[...]
            out_ref[:, 0, :] = out.astype(out_ref.dtype)


# ----------------------------------------------------------------------------
# Host-side packing + pallas_call wrapper
# ----------------------------------------------------------------------------
def _pick_batch_tile(B, batch_tile, per_batch_bytes, vmem_budget_bytes):
    bt = max(1, min(B, batch_tile,
                    max(1, vmem_budget_bytes // max(per_batch_bytes, 1))))
    while B % bt:                    # divisor of B -> no padded-batch waste
        bt -= 1
    if B // bt < 2 and B >= 2:       # v7x: give the parallel axis >= 2 grid steps
        bt = max(1, B // 2)
        while B % bt:
            bt -= 1
    return bt


def tcnn_forward(params, x, *, batch_tile=8, compute_dtype=jnp.float32):
    """x: (B, L, input_size) -- same convention as the PyTorch module input.

    compute_dtype=jnp.bfloat16 is recommended on v6e/v7x (native MXU, half the
    VMEM); the default f32 keeps exactness and suits v5e.
    """
    B, L, c_in = x.shape
    convs = params["convs"]
    n_levels = len(convs)
    dils = tuple(int(d) for (_w, _b, d) in convs)
    in_chs = [c_in] + [w.shape[2] for (w, _b, _d) in convs[:-1]]
    out_chs = [w.shape[2] for (w, _b, _d) in convs]
    cins = tuple(_round_up(c, 128) for c in in_chs)    # per-level lane-dense widths
    couts = tuple(_round_up(c, 128) for c in out_chs)
    c_pad = max(max(cins), max(couts))
    o_dim = params["lin_w"].shape[1]

    # Static sequence bookkeeping: level-i valid input length, fixed 8-aligned
    # time origin P, and a sublane-aligned buffer length.
    lens = [L]
    for d in dils[:-1]:
        lens.append(lens[-1] + d)
    lens = tuple(lens)
    P = _round_up(max(dils), 8)
    l_buf = P + _round_up(lens[-1], 8)

    # Batch tiling: divisor of B, capped by a VMEM budget, >= 2 grid steps.
    itemsize = jnp.dtype(compute_dtype).itemsize
    per_batch = l_buf * c_pad * (4 * itemsize + 12)     # scratch + input + f32 temps
    bt = _pick_batch_tile(B, batch_tile, per_batch, 40 << 20)
    n_steps = B // bt

    # Host-side level-0 staging: channel padding + fixed-origin placement, so
    # the kernel never issues lane-sparse or misaligned staging stores.
    xs = jnp.zeros((B, l_buf, c_pad), compute_dtype)
    xs = xs.at[:, P:P + L, :c_in].set(x.astype(compute_dtype))

    # One-time weight packing (taps kept separate -> two accumulating matmuls).
    w_all = jnp.zeros((2 * n_levels, c_pad, c_pad), compute_dtype)
    b_all = jnp.zeros((n_levels, 1, c_pad), jnp.float32)
    for i, (w, b, _d) in enumerate(convs):
        _k, ci, co = w.shape
        w_all = w_all.at[2 * i, :ci, :co].set(w[0].astype(compute_dtype))
        w_all = w_all.at[2 * i + 1, :ci, :co].set(w[1].astype(compute_dtype))
        b_all = b_all.at[i, 0, :co].set(b[0])
    lw = jnp.zeros((c_pad, o_dim), compute_dtype)
    lw = lw.at[:out_chs[-1], :].set(params["lin_w"].astype(compute_dtype))
    lb = params["lin_b"].astype(jnp.float32).reshape(1, o_dim)

    kernel = functools.partial(_tcnn_fused_kernel, dils=dils, lens=lens,
                               cins=cins, couts=couts, origin=P)

    # VMEM budget: scratch ping-pong + double-buffered input block + resident
    # weights + f32 matmul temporaries.  Clamp to [32 MiB, 64 MiB] so the same
    # setting is never more restrictive than the default and fits v7x's 64 MiB.
    buf_shape = (bt, l_buf, c_pad)
    stub = (8, 128)                    # 2nd ping-pong buffer only needed for >=3 levels
    need_buf1 = n_levels >= 3
    est = (bt * l_buf * c_pad * itemsize * (3 + (1 if need_buf1 else 0))
           + 2 * w_all.size * itemsize + 4 * b_all.size
           + 3 * bt * l_buf * c_pad * 4)
    vmem_limit = int(min(64 << 20, max(32 << 20, 2 * est)))

    out = pl.pallas_call(
        kernel,
        out_shape=jax.ShapeDtypeStruct((B, 1, o_dim), jnp.float32),
        grid=(n_steps,),
        in_specs=[
            pl.BlockSpec((bt, l_buf, c_pad), lambda i: (i, 0, 0)),
            pl.BlockSpec((2 * n_levels, c_pad, c_pad), lambda i: (0, 0, 0)),
            pl.BlockSpec((n_levels, 1, c_pad), lambda i: (0, 0, 0)),
            pl.BlockSpec((c_pad, o_dim), lambda i: (0, 0)),
            pl.BlockSpec((1, o_dim), lambda i: (0, 0)),
        ],
        out_specs=pl.BlockSpec((bt, 1, o_dim), lambda i: (i, 0, 0)),
        scratch_shapes=[
            pltpu.VMEM(buf_shape, compute_dtype),
            pltpu.VMEM(buf_shape if need_buf1 else stub, compute_dtype),
        ],
        compiler_params=pltpu.CompilerParams(
            dimension_semantics=("parallel",),
            vmem_limit_bytes=vmem_limit),
    )(xs, w_all, b_all, lw, lb)
    return out[:, 0, :]


# ----------------------------------------------------------------------------
# Deterministic param init + pure-JAX reference
# ----------------------------------------------------------------------------
def init_tcnn_params(key, input_size, output_size, num_channels, kernel_size=2):
    assert kernel_size == 2, "this Pallas implementation specializes kernel_size=2"
    params = {"convs": []}
    in_ch = input_size
    for i, out_ch in enumerate(num_channels):
        key, kw, kb = jax.random.split(key, 3)
        # stored tap-major: (K, C_in, C_out)
        w = 0.1 * jax.random.normal(kw, (kernel_size, in_ch, out_ch), jnp.float32)
        b = 0.1 * jax.random.normal(kb, (1, out_ch), jnp.float32)
        params["convs"].append((w, b, 2 ** i))
        in_ch = out_ch
    key, kw, kb = jax.random.split(key, 3)
    params["lin_w"] = 0.1 * jax.random.normal(kw, (in_ch, output_size), jnp.float32)
    params["lin_b"] = 0.1 * jax.random.normal(kb, (1, output_size), jnp.float32)
    return params


def tcnn_reference(params, x):
    """Pure-JAX reference with the same math (symmetric pad, ReLU, last step)."""
    out = x
    for (w, b, dil) in params["convs"]:
        pad = dil
        xpad = jnp.pad(out, ((0, 0), (pad, pad), (0, 0)))
        l_out = out.shape[1] + dil
        y = (jnp.einsum("blc,co->blo", xpad[:, :l_out, :], w[0])
             + jnp.einsum("blc,co->blo", xpad[:, dil:dil + l_out, :], w[1])
             + b[0])
        out = jnp.maximum(y, 0.0)
    return out[:, -1, :] @ params["lin_w"] + params["lin_b"][0]


if __name__ == "__main__":
    key = jax.random.PRNGKey(0)
    k_params, k_x = jax.random.split(key)

    # Small shapes consistent with the module's forward.
    B, L, input_size = 2, 16, 4
    num_channels = [8, 16]
    output_size = 3

    params = init_tcnn_params(k_params, input_size, output_size, num_channels)
    x = jax.random.normal(k_x, (B, L, input_size), jnp.float32)

    y = tcnn_forward(params, x)            # f32 path (exact vs reference)
    y = jax.block_until_ready(y)

    y_ref = tcnn_reference(params, x)
    assert y.shape == (B, output_size)
    assert jnp.allclose(y, y_ref, atol=1e-4, rtol=1e-4), "mismatch vs reference"

    print("KERNEL_OK")
</pallas_src>

<mosaic_0001>
module attributes {stable_mosaic.version = 11 : i64} {
  func.func @_tcnn_fused_kernel(%arg0: i32, %arg1: memref<1x32x128xf32, #tpu.memory_space<vmem>>, %arg2: memref<4x128x128xf32, #tpu.memory_space<vmem>>, %arg3: memref<2x1x128xf32, #tpu.memory_space<vmem>>, %arg4: memref<128x3xf32, #tpu.memory_space<vmem>>, %arg5: memref<1x3xf32, #tpu.memory_space<vmem>>, %arg6: memref<1x1x3xf32, #tpu.memory_space<vmem>>, %arg7: memref<1x32x128xf32, #tpu.memory_space<vmem>>, %arg8: memref<8x128xf32, #tpu.memory_space<vmem>>) attributes {dimension_semantics = [#tpu.dimension_semantics<parallel>], iteration_bounds = array<i64: 2>, scalar_prefetch = 0 : i64, scratch_operands = 2 : i64, tpu.core_type = #tpu.core_type<tc>, window_params = [{transform_indices = @transform_0, window_bounds = array<i64: 1, 32, 128>}, {pipeline_mode = #tpu.pipeline_mode<synchronous>, transform_indices = @transform_1, window_bounds = array<i64: 4, 128, 128>}, {pipeline_mode = #tpu.pipeline_mode<synchronous>, transform_indices = @transform_2, window_bounds = array<i64: 2, 1, 128>}, {pipeline_mode = #tpu.pipeline_mode<synchronous>, transform_indices = @transform_3, window_bounds = array<i64: 128, 3>}, {pipeline_mode = #tpu.pipeline_mode<synchronous>, transform_indices = @transform_4, window_bounds = array<i64: 1, 3>}, {transform_indices = @transform_5, window_bounds = array<i64: 1, 1, 3>}]} {
    %cst = arith.constant 0.000000e+00 : f32
    %0 = vector.broadcast %cst : f32 to vector<1x8x128xf32>
    %c0 = arith.constant 0 : index
    %c0_0 = arith.constant 0 : index
    %c0_1 = arith.constant 0 : index
    %1 = vector.load %arg7[%c0, %c0_0, %c0_1] : memref<1x32x128xf32, #tpu.memory_space<vmem>>, vector<1x8x128xf32>
    tpu.vector_store %arg7[%c0, %c0_0, %c0_1], %0 {strides = array<i32>} : memref<1x32x128xf32, #tpu.memory_space<vmem>>, vector<1x8x128xf32>,
    %c0_2 = arith.constant 0 : index
    %c0_3 = arith.constant 0 : index
    %c0_4 = arith.constant 0 : index
    %2 = vector.load %arg2[%c0_2, %c0_3, %c0_4] : memref<4x128x128xf32, #tpu.memory_space<vmem>>, vector<1x128x128xf32>
    %3 = vector.shape_cast %2 : vector<1x128x128xf32> to vector<128x128xf32>
    %c1 = arith.constant 1 : index
    %c0_5 = arith.constant 0 : index
    %c0_6 = arith.constant 0 : index
    %4 = vector.load %arg2[%c1, %c0_5, %c0_6] : memref<4x128x128xf32, #tpu.memory_space<vmem>>, vector<1x128x128xf32>
    %5 = vector.shape_cast %4 : vector<1x128x128xf32> to vector<128x128xf32>
    %c0_7 = arith.constant 0 : index
    %c0_8 = arith.constant 0 : index
    %c0_9 = arith.constant 0 : index
    %6 = vector.load %arg3[%c0_7, %c0_8, %c0_9] : memref<2x1x128xf32, #tpu.memory_space<vmem>>, vector<1x1x128xf32>
    %7 = vector.shape_cast %6 : vector<1x1x128xf32> to vector<1x128xf32>
    %c0_10 = arith.constant 0 : index
    %c8 = arith.constant 8 : index
    %c0_11 = arith.constant 0 : index
    %8 = vector.load %arg1[%c0_10, %c8, %c0_11] : memref<1x32x128xf32, #tpu.memory_space<vmem>>, vector<1x24x128xf32>
    %9 = vector.shape_cast %8 : vector<1x24x128xf32> to vector<24x128xf32>
    %c0_12 = arith.constant 0 : index
    %c7 = arith.constant 7 : index
    %c0_13 = arith.constant 0 : index
    %10 = vector.load %arg1[%c0_12, %c7, %c0_13] : memref<1x32x128xf32, #tpu.memory_space<vmem>>, vector<1x24x128xf32>
    %11 = vector.shape_cast %10 : vector<1x24x128xf32> to vector<24x128xf32>
    %cst_14 = arith.constant dense<0.000000e+00> : vector<24x128xf32>
    %12 = tpu.matmul %11, %3, %cst_14 {dimension_numbers = #tpu.dot_dimension_numbers<[1], [0], [0], [1], [0, 0, 1, 1], [], []>} : vector<24x128xf32>, vector<128x128xf32>, vector<24x128xf32> -> vector<24x128xf32>
    %cst_15 = arith.constant dense<0.000000e+00> : vector<24x128xf32>
    %13 = tpu.matmul %9, %5, %cst_15 {dimension_numbers = #tpu.dot_dimension_numbers<[1], [0], [0], [1], [0, 0, 1, 1], [], []>} : vector<24x128xf32>, vector<128x128xf32>, vector<24x128xf32> -> vector<24x128xf32>
    %14 = arith.addf %12, %13 : vector<24x128xf32>
    %15 = vector.broadcast %7 : vector<1x128xf32> to vector<24x128xf32>
    %16 = arith.addf %14, %15 : vector<24x128xf32>
    %cst_16 = arith.constant 0.000000e+00 : f32
    %17 = vector.broadcast %cst_16 : f32 to vector<24x128xf32>
    %18 = arith.maximumf %16, %17 : vector<24x128xf32>
    %19 = vector.shape_cast %18 : vector<24x128xf32> to vector<1x24x128xf32>
    %c0_17 = arith.constant 0 : index
    %c8_18 = arith.constant 8 : index
    %c0_19 = arith.constant 0 : index
    %20 = vector.load %arg7[%c0_17, %c8_18, %c0_19] : memref<1x32x128xf32, #tpu.memory_space<vmem>>, vector<1x24x128xf32>
    tpu.vector_store %arg7[%c0_17, %c8_18, %c0_19], %19 {strides = array<i32>} : memref<1x32x128xf32, #tpu.memory_space<vmem>>, vector<1x24x128xf32>,
    %c2 = arith.constant 2 : index
    %c0_20 = arith.constant 0 : index
    %c0_21 = arith.constant 0 : index
    %21 = vector.load %arg2[%c2, %c0_20, %c0_21] : memref<4x128x128xf32, #tpu.memory_space<vmem>>, vector<1x128x128xf32>
    %22 = vector.shape_cast %21 : vector<1x128x128xf32> to vector<128x128xf32>
    %c1_22 = arith.constant 1 : index
    %c0_23 = arith.constant 0 : index
    %c0_24 = arith.constant 0 : index
    %23 = vector.load %arg3[%c1_22, %c0_23, %c0_24] : memref<2x1x128xf32, #tpu.memory_space<vmem>>, vector<1x1x128xf32>
    %24 = vector.shape_cast %23 : vector<1x1x128xf32> to vector<1x128xf32>
    %c0_25 = arith.constant 0 : index
    %c24 = arith.constant 24 : index
    %c0_26 = arith.constant 0 : index
    %25 = vector.load %arg7[%c0_25, %c24, %c0_26] : memref<1x32x128xf32, #tpu.memory_space<vmem>>, vector<1x1x128xf32>
    %26 = vector.shape_cast %25 : vector<1x1x128xf32> to vector<1x128xf32>
    %cst_27 = arith.constant dense<0.000000e+00> : vector<1x128xf32>
    %27 = tpu.matmul %26, %22, %cst_27 {dimension_numbers = #tpu.dot_dimension_numbers<[1], [0], [0], [1], [0, 0, 1, 1], [], []>} : vector<1x128xf32>, vector<128x128xf32>, vector<1x128xf32> -> vector<1x128xf32>
    %28 = arith.addf %27, %24 : vector<1x128xf32>
    %cst_28 = arith.constant 0.000000e+00 : f32
    %29 = vector.broadcast %cst_28 : f32 to vector<1x128xf32>
    %30 = arith.maximumf %28, %29 : vector<1x128xf32>
    %c0_29 = arith.constant 0 : index
    %c0_30 = arith.constant 0 : index
    %31 = vector.load %arg4[%c0_29, %c0_30] : memref<128x3xf32, #tpu.memory_space<vmem>>, vector<128x3xf32>
    %cst_31 = arith.constant dense<0.000000e+00> : vector<1x3xf32>
    %32 = tpu.matmul %30, %31, %cst_31 {dimension_numbers = #tpu.dot_dimension_numbers<[1], [0], [0], [1], [0, 0, 1, 1], [], []>} : vector<1x128xf32>, vector<128x3xf32>, vector<1x3xf32> -> vector<1x3xf32>
    %c0_32 = arith.constant 0 : index
    %c0_33 = arith.constant 0 : index
    %33 = vector.load %arg5[%c0_32, %c0_33] : memref<1x3xf32, #tpu.memory_space<vmem>>, vector<1x3xf32>
    %34 = arith.addf %32, %33 : vector<1x3xf32>
    %c0_34 = arith.constant 0 : index
    %c0_35 = arith.constant 0 : index
    %c0_36 = arith.constant 0 : index
    %35 = vector.load %arg6[%c0_34, %c0_35, %c0_36] : memref<1x1x3xf32, #tpu.memory_space<vmem>>, vector<1x1x3xf32>
    %36 = vector.shape_cast %35 : vector<1x1x3xf32> to vector<1x3xf32>
    %37 = vector.shape_cast %34 : vector<1x3xf32> to vector<1x1x3xf32>
    tpu.vector_store %arg6[%c0_34, %c0_35, %c0_36], %37 {strides = array<i32>} : memref<1x1x3xf32, #tpu.memory_space<vmem>>, vector<1x1x3xf32>,
    return
  }
  func.func @transform_0(%arg0: i32) -> (i32, i32, i32) {
    %c0_i32 = arith.constant 0 : i32
    %c0_i32_0 = arith.constant 0 : i32
    %c0_i32_1 = arith.constant 0 : i32
    return %arg0, %c0_i32, %c0_i32_0 : i32, i32, i32
  }
  func.func @transform_1(%arg0: i32) -> (i32, i32, i32) {
    %c0_i32 = arith.constant 0 : i32
    %c0_i32_0 = arith.constant 0 : i32
    %c0_i32_1 = arith.constant 0 : i32
    %c0_i32_2 = arith.constant 0 : i32
    return %c0_i32, %c0_i32_0, %c0_i32_1 : i32, i32, i32
  }
  func.func @transform_2(%arg0: i32) -> (i32, i32, i32) {
    %c0_i32 = arith.constant 0 : i32
    %c0_i32_0 = arith.constant 0 : i32
    %c0_i32_1 = arith.constant 0 : i32
    %c0_i32_2 = arith.constant 0 : i32
    return %c0_i32, %c0_i32_0, %c0_i32_1 : i32, i32, i32
  }
  func.func @transform_3(%arg0: i32) -> (i32, i32) {
    %c0_i32 = arith.constant 0 : i32
    %c0_i32_0 = arith.constant 0 : i32
    %c0_i32_1 = arith.constant 0 : i32
    return %c0_i32, %c0_i32_0 : i32, i32
  }
  func.func @transform_4(%arg0: i32) -> (i32, i32) {
    %c0_i32 = arith.constant 0 : i32
    %c0_i32_0 = arith.constant 0 : i32
    %c0_i32_1 = arith.constant 0 : i32
    return %c0_i32, %c0_i32_0 : i32, i32
  }
  func.func @transform_5(%arg0: i32) -> (i32, i32, i32) {
    %c0_i32 = arith.constant 0 : i32
    %c0_i32_0 = arith.constant 0 : i32
    %c0_i32_1 = arith.constant 0 : i32
    return %arg0, %c0_i32, %c0_i32_0 : i32, i32, i32
  }
}

</mosaic_0001>

<bundles_post_ra>
// kernel: tpu_custom_call.1
= control target key start
LH: loop header
LB: loop body
LE: loop exit
PB: predicated region body
PF: predicated region fallthrough
CT: control target
= control target key end

     0   :  { %10 = vsyncpa [#allocation5], 0  ;;  %s1475_s0 = inlined_call_operand.vmem [shape: f32[2,32,128], index: 0, kind: input, shape index: {}]   ;;  %s1476_s1 = inlined_call_operand.hbm [shape: f32[4,128,128], index: 1, kind: input, shape index: {}]   ;;  %s1477_s2 = inlined_call_operand.vmem [shape: f32[2,1,128], index: 2, kind: input, shape index: {}]   ;;  %s1478_s3 = inlined_call_operand.vmem [shape: f32[128,3], index: 3, kind: input, shape index: {}]   ;;  %s1479_s4 = inlined_call_operand.vmem [shape: f32[1,3], index: 4, kind: input, shape index: {}]   ;;  %s1480_s5 = inlined_call_operand.hbm [shape: f32[2,1,3], index: 5, kind: output, shape index: {}]  }
   0x1   :  { %11 = vsyncpa [#allocation6], 0 }
   0x2   :  { %13 = vsyncpa [#allocation6 + $0x1], 0  ;;  %s1235_s18 = smov 0   ;;  %s1237_s19 = smov 0  }
   0x3   :  { %s1239_s20 = smov 0   ;;  %s1241_s21 = smov 0  }
   0x4 LB: > { %s1256_s22 = sadd.s32 4294967295, %s1196_s21   ;;  %s713_s23 = sadd.s32 4294967294, %s1196_s21   ;;  %s1196_s21 = sphi %s1241_s21, %s1496_s21   ;;  %s1192_s20 = sphi %s1239_s20, %s1495_s20   ;;  %s1188_s19 = sphi %s1237_s19, %s1494_s19   ;;  %s1184_s18 = sphi %s1235_s18, %s1493_s18  }
   0x5   : > { %s1260_s24 = sadd.s32 1, %s1196_s21   ;;  %s136_s25 = sadd.s32 1, %s1192_s20 }
   0x6   : > { %s133_s26 = ssub.s32 %s1196_s21, %s1260_s24  ;;  %p146_p0 = scmp.ne.s32.totalorder %s1192_s20, %s1188_s19 }
   0x7   : > { %p134_p1 = scmp.eq.s32.totalorder %s133_s26, 0  ;;  %p147_p2 = scmp.eq.s32.totalorder %s1256_s22, 1 }
   0x8   : > { %p152_p3 = scmp.ne.s32.totalorder %s1188_s19, %s1184_s18  ;;  %p153_p4 = scmp.eq.s32.totalorder %s713_s23, 1 }
   0x9   : > { %s1271_s27 = scalar_select %p134_p1, %s1192_s20, %s136_s25  }
   0xa   : > { %p1273_p5 = por %p147_p2, %p146_p0  ;;  %p1277_p6 = por %p153_p4, %p152_p3 }
   0xb   : > { %p714_p7 = scmp.ge.s32.totalorder %s1196_s21, 1  ;;  %p160_p8 = scmp.lt.s32.totalorder %s1196_s21, 3 }
   0xc   : > { %s1484_s28 = scalar_select %p1273_p5, 1, 0 }
   0xd   : > { %s1485_s29 = scalar_select %p1277_p6, 1, 0 }
   0xe   : > { %p1481_p9 = scmp.eq.s32.totalorder %s1256_s22, 0  ;;  %p1284_p10 = pnand %p714_p7, %p160_p8 }
   0xf   : > { %s1198_s6 = smov [#allocation4]   ;;  %s1102_s11 = scalar_lea.hbm %s1476_s1, 8192 }
  0x10   : > { %s1486_s30 = scalar_select %p1284_p10, 1, 0 }
  0x11   : > { %s172_s7 = sshll.u32 %s1198_s6, 4  ;;  %p1053_p11 = pneg %p1284_p10  ;;  %s173_s7 = int_to_ptr.vmem [resolvable:$true] %s172_s7 }
  0x12   : > { %p1103_p13 = scmp.ne.s32.totalorder %s1476_s1, %s1102_s11  ;;  %p1109_p3 = scmp.lt.u32.totalorder %s1102_s11, %s1476_s1 }
  0x13   : > { %p1292_p12 = pnand %p1481_p9, %p1053_p11 }
  0x15   : > { %p1104_p0 = pneg %p1292_p12 }
  0x17   : > { %p1105_p1 = pnand %p1104_p0, %p1103_p13 }
  0x19   : > { %p1106_p2 = pneg %p1105_p1 }
  0x1b   : > { %p1111_p4 = pnand %p1109_p3, %p1106_p2 }
  0x1d   : > { %1114 = shalt.err (!%p1111_p4)
}
  0x1e   : > { %s1115_s16 = scalar_lea.vmem %s173_s7, 8192  ;;  %p1123_p9 = scmp.lt.s32.totalorder %s173_s7, %s173_s7 }
  0x1f   : > { %p1116_p7 = scmp.ne.s32.totalorder %s173_s7, %s1115_s16  ;;  %p1124_p6 = scmp.lt.s32.totalorder %s1115_s16, %s1115_s16 }
  0x21   : > { %p1118_p8 = pnand %p1116_p7, %p1104_p0  ;;  %p1125_p5 = por %p1124_p6, %p1123_p9 }
  0x23   : > { %p1119_p11 = pneg %p1118_p8 }
  0x25   : > { %p1126_p10 = pnand %p1125_p5, %p1119_p11 }
  0x27   : > { %1129 = shalt.err (!%p1126_p10)
}
  0x28   : > { %s1199_s17 = smov 128   ;;  %s1200_s23 = smov 8  }
  0x29   : > { %1056 = dma.hbm_to_vmem [thread:$0]  (!%p1292_p12), %s1476_s1, 8192, %s173_s7, [#allocation5], %s1199_s17, %s1199_s17, %s1200_s23  }
  0x2a   : > { %p1488_p13 = scmp.ne.s32.totalorder %s1486_s30, 0 }
  0x2b   : > { %p1489_p1 = scmp.eq.s32.totalorder (!%p1488_p13), %s1256_s22, 0 }
  0x2c   : > { %205 = sbr.rel (%p1488_p13) target bundleno = 765 (0x2fd), region = 40 }
  0x33   : > { %1175 = dma.done.wait (%p1489_p1), [#allocation5], 8192   ;;  %p1490_p0 = pmov %p1489_p1 }
  0x34   : > { %v1201_v0 = vmov 0.0|0.0   ;;  %vm1202_vm0 = vmmov 0   ;;  %v1203_v1 = vmov 0.0   ;;  %v255_v2 = vld [vmem:[#allocation4 + $0x80] sm:$0xff]  ;;  %v256_v3 = vld [vmem:[#allocation4 + $0x88] sm:$0xff]  ;;  %v257_v7 = vld [vmem:[#allocation4 + $0x90] sm:$0xff] }
  0x35   : > { %1177 = vsyncadd (%p1490_p0), [#allocation5], 4294959104  ;;  %951 = vmatprep.subr.bf16.mxu0 %v1201_v0  ;;  %975 = vmatprep.subr.bf16.mxu1 %v1201_v0  ;;  %v238_v4 = vld [vmem:[#allocation4] sm:$0xff]  ;;  %v952_v5 = vpack.c.bf16 %v256_v3, %v255_v2  ;;  %v239_v6 = vld [vmem:[#allocation4 + $0x8] sm:$0xff]  ;;  %p232_p5 = scmp.lt.s32.totalorder %s1256_s22, 1  ;;  %s230_s14 = sand.u32 1, %s1188_s19  }
  0x36   : > { %831 = vmatprep.mubr.msk.f32.mxu0 %vm1202_vm0, %v1203_v1  ;;  %872 = vmatprep.mubr.msk.f32.mxu1 %vm1202_vm0, %v1203_v1  ;;  %v258_v8 = vld [vmem:[#allocation4 + $0x98] sm:$0xff]  ;;  %v976_v9 = vpack.c.bf16 %v239_v6, %v238_v4  ;;  %v240_v10 = vld [vmem:[#allocation4 + $0x10] sm:$0xff]  ;;  %v259_v14 = vld [vmem:[#allocation4 + $0xa0] sm:$0xff]  ;;  %s723_s17 = sshll.u32 %s1256_s22, 4  ;;  %s231_s23 = scalar_lea.vmem [#allocation7], %s230_s14  ;;  %vm631_vm1 = vcmask 16384  }
  0x37   : > { %v241_v11 = vld [vmem:[#allocation4 + $0x18] sm:$0xff]  ;;  %953 = vmatpush3.bf16.msra.mxu0 %v952_v5  ;;  %v955_v12 = vpack.c.bf16 %v258_v8, %v257_v7  ;;  %v260_v15 = vld [vmem:[#allocation4 + $0xa8] sm:$0xff]  ;;  %v242_v16 = vld [vmem:[#allocation4 + $0x20] sm:$0xff]  ;;  %s233_s30 = scalar_select %p232_p5, %s1256_s22, 1 }
  0x38   : > { %977 = vmatpush3.bf16.msra.mxu1 %v976_v9  ;;  %954 = vmatprep.subr.bf16.mxu0 %v1201_v0  ;;  %v979_v13 = vpack.c.bf16 %v241_v11, %v240_v10  ;;  %v243_v17 = vld [vmem:[#allocation4 + $0x28] sm:$0xff]  ;;  %v958_v18 = vpack.c.bf16 %v260_v15, %v259_v14  ;;  %v261_v20 = vld [vmem:[#allocation4 + $0xb0] sm:$0xff]  ;;  %v262_v21 = vld [vmem:[#allocation4 + $0xb8] sm:$0xff]  ;;  %s646_s25 = sshll.u32 %s231_s23, 4  ;;  %s634_s7 = scalar_lea.sflag [#allocation6], %s230_s14  ;;  %s1435_s25 = int_to_ptr.vmem [resolvable:$true] %s646_s25 }
  0x39   : > { %978 = vmatprep.subr.bf16.mxu1 %v1201_v0  ;;  %v982_v19 = vpack.c.bf16 %v243_v17, %v242_v16  ;;  %v244_v22 = vld [vmem:[#allocation4 + $0x30] sm:$0xff]  ;;  %v245_v23 = vld [vmem:[#allocation4 + $0x38] sm:$0xff]  ;;  %v961_v24 = vpack.c.bf16 %v262_v21, %v261_v20  ;;  %v263_v26 = vld [vmem:[#allocation4 + $0xc0] sm:$0xff]  ;;  %s726_s6 = sshll.u32 %s233_s30, 5  ;;  %s1130_s8 = scalar_lea.vmem %s1435_s25, 16 }
  0x3a   : > { %v985_v25 = vpack.c.bf16 %v245_v23, %v244_v22  ;;  %v264_v27 = vld [vmem:[#allocation4 + $0xc8] sm:$0xff]  ;;  %v246_v28 = vld [vmem:[#allocation4 + $0x40] sm:$0xff]  ;;  %v265_v32 = vld [vmem:[#allocation4 + $0xd0] sm:$0xff]  ;;  %s236_s9 = scalar_lea.vmem %s1475_s0, %s726_s6  ;;  %s1433_s6 = scalar_lea.hbm %s1480_s5, %s723_s17 }
  0x3b   : > { %956 = vmatpush3.bf16.msra.mxu0 %v955_v12  ;;  %v247_v29 = vld [vmem:[#allocation4 + $0x48] sm:$0xff]  ;;  %v964_v30 = vpack.c.bf16 %v264_v27, %v263_v26  ;;  %v266_v33 = vld [vmem:[#allocation4 + $0xd8] sm:$0xff]  ;;  %v248_v34 = vld [vmem:[#allocation4 + $0x50] sm:$0xff]  ;;  %p1131_p6 = scmp.ne.s32.totalorder %s1435_s25, %s1130_s8  ;;  %p1491_p9 = scmp.ne.s32.totalorder %s1484_s28, 0 }
  0x3c   : > { %980 = vmatpush3.bf16.msra.mxu1 %v979_v13  ;;  %957 = vmatprep.subr.bf16.mxu0 %v1201_v0  ;;  %v988_v31 = vpack.c.bf16 %v247_v29, %v246_v28  ;;  %v249_v35 = vld [vmem:[#allocation4 + $0x58] sm:$0xff]  ;;  %v967_v36 = vpack.c.bf16 %v266_v33, %v265_v32  ;;  %v267_v38 = vld [vmem:[#allocation4 + $0xe0] sm:$0xff]  ;;  %v268_v39 = vld [vmem:[#allocation4 + $0xe8] sm:$0xff]  ;;  %s1204_s22 = smov [#allocation7]  }
  0x3d   : > { %981 = vmatprep.subr.bf16.mxu1 %v1201_v0  ;;  %v991_v37 = vpack.c.bf16 %v249_v35, %v248_v34  ;;  %v250_v40 = vld [vmem:[#allocation4 + $0x60] sm:$0xff]  ;;  %v251_v41 = vld [vmem:[#allocation4 + $0x68] sm:$0xff]  ;;  %v970_v42 = vpack.c.bf16 %v268_v39, %v267_v38  ;;  %v269_v44 = vld [vmem:[#allocation4 + $0xf0] sm:$0xff]  ;;  %p1132_p10 = pnand %p1131_p6, %p1491_p9 }
  0x3e   : > { %v994_v43 = vpack.c.bf16 %v251_v41, %v250_v40  ;;  %v270_v45 = vld [vmem:[#allocation4 + $0xf8] sm:$0xff]  ;;  %v252_v46 = vld [vmem:[#allocation4 + $0x70] sm:$0xff]  ;;  %v454_v50 = vld [vmem:[#allocation4 + $0x100] sm:$0xff] }
  0x3f   : > { %959 = vmatpush3.bf16.msra.mxu0 %v958_v18  ;;  %v253_v47 = vld [vmem:[#allocation4 + $0x78] sm:$0xff]  ;;  %v973_v48 = vpack.c.bf16 %v270_v45, %v269_v44  ;;  %v455_v51 = vld [vmem:[#allocation4 + $0x108] sm:$0xff]  ;;  %v456_v55 = vld [vmem:[#allocation4 + $0x110] sm:$0xff]  ;;  %p1133_p12 = pneg %p1132_p10 }
  0x40   : > { %983 = vmatpush3.bf16.msra.mxu1 %v982_v19  ;;  %960 = vmatprep.subr.bf16.mxu0 %v1201_v0  ;;  %v997_v49 = vpack.c.bf16 %v253_v47, %v252_v46  ;;  %v272_v52 = vld [vmem:[%s236_s9 + $0x8] sm:$0xff]  ;;  %v1000_v54 = vpack.c.bf16 %v455_v51, %v454_v50  ;;  %v457_v56 = vld [vmem:[#allocation4 + $0x118] sm:$0xff]  ;;  %v273_v57 = vld [vmem:[%s236_s9 + $0x10] sm:$0xff] }
  0x41   : > { %984 = vmatprep.subr.bf16.mxu1 %v1201_v0  ;;  %v275_v53 = vld [vmem:[%s236_s9 + $0x7] sm:$0xff]  ;;  %v276_v58 = vld [vmem:[%s236_s9 + $0xf] sm:$0xff]  ;;  %v1003_v59 = vpack.c.bf16 %v457_v56, %v456_v55  ;;  %v274_v60 = vld [vmem:[%s236_s9 + $0x18] sm:$0xff] }
  0x42   : > { %v277_v61 = vld [vmem:[%s236_s9 + $0x17] sm:$0xff]  ;;  %v458_v62 = vld [vmem:[#allocation4 + $0x120] sm:$0xff]  ;;  %v459_v63 = vld [vmem:[#allocation4 + $0x128] sm:$0xff]  ;;  %s1134_s9 = sshll.u32 %s1204_s22, 4  ;;  %s1135_s9 = int_to_ptr.vmem [resolvable:$false] %s1134_s9 }
  0x43   : > { %962 = vmatpush3.bf16.msra.mxu0 %v961_v24  ;;  %v1006_v2 = vpack.c.bf16 %v459_v63, %v458_v62  ;;  %v460_v3 = vld [vmem:[#allocation4 + $0x130] sm:$0xff]  ;;  %v461_v4 = vld [vmem:[#allocation4 + $0x138] sm:$0xff]  ;;  %v462_v6 = vld [vmem:[#allocation4 + $0x140] sm:$0xff]  ;;  %s1136_s10 = scalar_lea.vmem %s1135_s9, 32  ;;  %p1137_p2 = scmp.lt.s32.totalorder %s1435_s25, %s1135_s9 }
  0x44   : > { %986 = vmatpush3.bf16.msra.mxu1 %v985_v25  ;;  %963 = vmatprep.subr.bf16.mxu0 %v1201_v0  ;;  %v1009_v5 = vpack.c.bf16 %v461_v4, %v460_v3  ;;  %v463_v7 = vld [vmem:[#allocation4 + $0x148] sm:$0xff]  ;;  %v464_v9 = vld [vmem:[#allocation4 + $0x150] sm:$0xff]  ;;  %v466_v11 = vld [vmem:[#allocation4 + $0x160] sm:$0xff]  ;;  %p1138_p3 = scmp.lt.s32.totalorder %s1136_s10, %s1130_s8 }
  0x45   : > { %987 = vmatprep.subr.bf16.mxu1 %v1201_v0  ;;  %v1012_v8 = vpack.c.bf16 %v463_v7, %v462_v6  ;;  %v467_v12 = vld [vmem:[#allocation4 + $0x168] sm:$0xff]  ;;  %v468_v14 = vld [vmem:[#allocation4 + $0x170] sm:$0xff]  ;;  %v469_v15 = vld [vmem:[#allocation4 + $0x178] sm:$0xff] }
  0x46   : > { %v1018_v13 = vpack.c.bf16 %v467_v12, %v466_v11  ;;  %v1021_v16 = vpack.c.bf16 %v469_v15, %v468_v14  ;;  %v544_v17 = vld [vmem:[%s1478_s3] sm:$0xff]  ;;  %v545_v18 = vld [vmem:[%s1478_s3 + $0x8] sm:$0xff]  ;;  %v546_v19 = vld [vmem:[%s1478_s3 + $0x10] sm:$0xff]  ;;  %p1139_p4 = por %p1138_p3, %p1137_p2 }
  0x47   : > { %965 = vmatpush3.bf16.msra.mxu0 %v964_v30  ;;  %v1024_v20 = vpack.c.bf16 %v545_v18, %v544_v17  ;;  %v547_v21 = vld [vmem:[%s1478_s3 + $0x18] sm:$0xff]  ;;  %v548_v23 = vld [vmem:[%s1478_s3 + $0x20] sm:$0xff]  ;;  %v549_v24 = vld [vmem:[%s1478_s3 + $0x28] sm:$0xff] }
  0x48   : > { %989 = vmatpush3.bf16.msra.mxu1 %v988_v31  ;;  %966 = vmatprep.subr.bf16.mxu0 %v1201_v0  ;;  %v1027_v22 = vpack.c.bf16 %v547_v21, %v546_v19  ;;  %v1030_v25 = vpack.c.bf16 %v549_v24, %v548_v23  ;;  %v550_v26 = vld [vmem:[%s1478_s3 + $0x30] sm:$0xff]  ;;  %v551_v27 = vld [vmem:[%s1478_s3 + $0x38] sm:$0xff]  ;;  %v552_v29 = vld [vmem:[%s1478_s3 + $0x40] sm:$0xff]  ;;  %p1140_p7 = pnand %p1139_p4, %p1133_p12 }
  0x49   : > { %990 = vmatprep.subr.bf16.mxu1 %v1201_v0  ;;  %v1033_v28 = vpack.c.bf16 %v551_v27, %v550_v26  ;;  %v553_v30 = vld [vmem:[%s1478_s3 + $0x48] sm:$0xff]  ;;  %v554_v32 = vld [vmem:[%s1478_s3 + $0x50] sm:$0xff]  ;;  %v555_v33 = vld [vmem:[%s1478_s3 + $0x58] sm:$0xff] }
  0x4a   : > { %v1036_v31 = vpack.c.bf16 %v553_v30, %v552_v29  ;;  %v1039_v34 = vpack.c.bf16 %v555_v33, %v554_v32  ;;  %v556_v35 = vld [vmem:[%s1478_s3 + $0x60] sm:$0xff]  ;;  %v559_v55 = vld [vmem:[%s1478_s3 + $0x78] sm:$0xff] }
  0x4b   : > { %968 = vmatpush3.bf16.msra.mxu0 %v967_v36  ;;  %v557_v36 = vld [vmem:[%s1478_s3 + $0x68] sm:$0xff]  ;;  %v721_v39 = vld [vmem:[%s1477_s2] ss:$0 sm:$0xff] }
  0x4c   : > { %992 = vmatpush3.bf16.msra.mxu1 %v991_v37  ;;  %969 = vmatprep.subr.bf16.mxu0 %v1201_v0  ;;  %v1042_v37 = vpack.c.bf16 %v557_v36, %v556_v35  ;;  %v560_v62 = vld [vmem:[%s1479_s4] sm:$0x1] }
  0x4d   : > { %993 = vmatprep.subr.bf16.mxu1 %v1201_v0 }
  0x4f   : > { %971 = vmatpush3.bf16.msra.mxu0 %v970_v42 }
  0x50   : > { %995 = vmatpush3.bf16.msra.mxu1 %v994_v43  ;;  %972 = vmatprep.subr.bf16.mxu0 %v1201_v0 }
  0x51   : > { %996 = vmatprep.subr.bf16.mxu1 %v1201_v0 }
  0x53   : > { %974 = vmatpush3.bf16.msra.mxu0 %v973_v48 }
  0x54   : > { %998 = vmatpush3.bf16.msra.mxu1 %v997_v49  ;;  %999 = vmatprep.subr.bf16.mxu0 %v1201_v0 }
  0x55   : > { %1023 = vmatprep.subr.bf16.mxu1 %v1201_v0 }
  0x56   : > { %832 = vmatmul.mubr.f32.vlgmr.msra.gmra.mrb[0].mxu0 %v272_v52 }
  0x57   : > { %873 = vmatmul.mubr.f32.vlgmr.msra.gmra.mrb[0].mxu1 %v275_v53  ;;  %834 = vmatprep.mubr.msk.f32.mxu0 %vm1202_vm0, %v1203_v1 }
  0x58   : > { %875 = vmatprep.mubr.msk.f32.mxu1 %vm1202_vm0, %v1203_v1  ;;  %1001 = vmatpush3.bf16.msra.mxu0 %v1000_v54  ;;  %v558_v54 = vld [vmem:[%s1478_s3 + $0x70] sm:$0xff] }
  0x59   : > { %1002 = vmatprep.subr.bf16.mxu0 %v1201_v0  ;;  %1025 = vmatpush3.bf16.msra.mxu1 %v1024_v20  ;;  %v1045_v56 = vpack.c.bf16 %v559_v55, %v558_v54 }
  0x5a   : > { %835 = vmatmul.mubr.f32.gmra.mrb[2].mxu0 %v273_v57  ;;  %1026 = vmatprep.subr.bf16.mxu1 %v1201_v0  ;;  %v722_v57 = vld [vmem:[%s1477_s2 + $0x1] sm:$0x1] }
  0x5b   : > { %876 = vmatmul.mubr.f32.gmra.mrb[2].mxu1 %v276_v58  ;;  %837 = vmatprep.mubr.msk.f32.mxu0 %vm1202_vm0, %v1203_v1 }
  0x5c   : > { %878 = vmatprep.mubr.msk.f32.mxu1 %vm1202_vm0, %v1203_v1  ;;  %1004 = vmatpush3.bf16.msra.mxu0 %v1003_v59 }
  0x5d   : > { %1005 = vmatprep.subr.bf16.mxu0 %v1201_v0  ;;  %1028 = vmatpush3.bf16.msra.mxu1 %v1027_v22 }
  0x5e   : > { %838 = vmatmul.mubr.f32.gmra.mrb[4].mxu0 %v274_v60  ;;  %1029 = vmatprep.subr.bf16.mxu1 %v1201_v0 }
  0x5f   : > { %879 = vmatmul.mubr.f32.gmra.mrb[4].mxu1 %v277_v61  ;;  %913 = vmatprep.mubr.msk.f32.mxu0 %vm1202_vm0, %v1203_v1 }
  0x60   : > { %948 = vmatprep.mubr.msk.f32.mxu1 %vm1202_vm0, %v1203_v1  ;;  %1007 = vmatpush3.bf16.msra.mxu0 %v1006_v2  ;;  %v465_v1 = vld [vmem:[#allocation4 + $0x158] sm:$0xff] }
  0x61   : > { %1008 = vmatprep.subr.bf16.mxu0 %v1201_v0  ;;  %v1015_v10 = vpack.c.bf16 %v465_v1, %v464_v9  ;;  %1031 = vmatpush3.bf16.msra.mxu1 %v1030_v25 }
  0x62   : > { %1032 = vmatprep.subr.bf16.mxu1 %v1201_v0 }
  0x64   : > { %1010 = vmatpush3.bf16.msra.mxu0 %v1009_v5 }
  0x65   : > { %1011 = vmatprep.subr.bf16.mxu0 %v1201_v0  ;;  %1034 = vmatpush3.bf16.msra.mxu1 %v1033_v28 }
  0x66   : > { %1035 = vmatprep.subr.bf16.mxu1 %v1201_v0 }
  0x68   : > { %1013 = vmatpush3.bf16.msra.mxu0 %v1012_v8 }
  0x69   : > { %1014 = vmatprep.subr.bf16.mxu0 %v1201_v0  ;;  %1037 = vmatpush3.bf16.msra.mxu1 %v1036_v31 }
  0x6a   : > { %1038 = vmatprep.subr.bf16.mxu1 %v1201_v0 }
  0x6c   : > { %1016 = vmatpush3.bf16.msra.mxu0 %v1015_v10 }
  0x6d   : > { %1017 = vmatprep.subr.bf16.mxu0 %v1201_v0  ;;  %1040 = vmatpush3.bf16.msra.mxu1 %v1039_v34 }
  0x6e   : > { %1041 = vmatprep.subr.bf16.mxu1 %v1201_v0 }
  0x70   : > { %1019 = vmatpush3.bf16.msra.mxu0 %v1018_v13 }
  0x71   : > { %1020 = vmatprep.subr.bf16.mxu0 %v1201_v0  ;;  %1043 = vmatpush3.bf16.msra.mxu1 %v1042_v37 }
  0x72   : > { %1044 = vmatprep.subr.bf16.mxu1 %v1201_v0 }
  0x74   : > { %1022 = vmatpush3.bf16.msra.mxu0 %v1021_v16 }
  0x75   : > { %1046 = vmatpush3.bf16.msra.mxu1 %v1045_v56 }
 0x129   : > { %v344_v38 = vpop.f32.mrb[0].mxu0 }
 0x12a   : > { %v424_v40 = vpop.f32.mrb[0].mxu1  ;;  %v833_v41 = vpop.f32.mrb[1].mxu0 }
 0x12b   : > { %v874_v42 = vpop.f32.mrb[1].mxu1 }
 0x12d   : > { %v349_v43 = vpop.f32.mrb[2].mxu0 }
 0x12e   : > { %v429_v44 = vpop.f32.mrb[2].mxu1  ;;  %v836_v45 = vpop.f32.mrb[3].mxu0 }
 0x12f   : > { %v877_v46 = vpop.f32.mrb[3].mxu1 }
 0x131   : > { %v354_v47 = vpop.f32.mrb[4].mxu0 }
 0x132   : > { %v434_v48 = vpop.f32.mrb[4].mxu1  ;;  %v839_v49 = vpop.f32.mrb[5].mxu0 }
 0x133   : > { %v435_v50 = vadd.f32 %v434_v48, %v354_v47  ;;  %v880_v51 = vpop.f32.mrb[5].mxu1 }
 0x135   : > { %v446_v52 = vadd.f32 %v721_v39, %v435_v50 }
 0x137   : > { %v449_v0 = vmax.f32 %v446_v52, 0.0 }
 0x139   : > { %452 = vst [vmem:[#allocation2 + $0x18] sm:$0xff] %v449_v0 }
 0x140   : > { %v472_v53 = vld [vmem:[#allocation2 + $0x18] sm:$0x1] }
 0x141   : > { %914 = vmatmul.mubr.f32.vlgmr.msra.gmra.mrb[6].mxu0 %v472_v53 }
 0x214   : > { %v539_v58 = vpop.f32.mrb[6].mxu0 }
 0x215   : > { %v540_v59 = vadd.f32 %v722_v57, %v539_v58  ;;  %v915_v60 = vpop.f32.mrb[7].mxu0 }
 0x217   : > { %v543_v61 = vmax.f32 %v540_v59, 0.0 }
 0x219   : > { %949 = vmatmul.mubr.f32.vlgmr.msra.gmra.mrb[6].mxu1 %v543_v61 }
 0x2ec   : > { %v627_v63 = vpop.f32.mrb[6].mxu1 }
 0x2ed   : > { %v628_v2 = vadd.f32 %v627_v63, %v560_v62  ;;  %v950_v3 = vpop.f32.mrb[7].mxu1 }
 0x2ef   : > { %632 = vst.msk [vmem:[%s231_s23] sm:$0x1] %vm631_vm1, %v628_v2 }
 0x2f0   : > { %1143 = shalt.err (!%p1140_p7)
}
 0x2f1   : > { %s1144_s11 = scalar_lea.hbm %s1433_s6, 16  ;;  %s1148_s14 = scalar_lea.hbm %s1480_s5, 32 }
 0x2f2   : > { %p1145_p8 = scmp.ne.s32.totalorder %s1433_s6, %s1144_s11  ;;  %p1149_p1 = scmp.lt.u32.totalorder %s1433_s6, %s1480_s5 }
 0x2f3   : > { %p1150_p0 = scmp.lt.u32.totalorder %s1148_s14, %s1144_s11  ;;  %p1152_p6 = scmp.lt.u32.totalorder %s1144_s11, %s1433_s6 }
 0x2f4   : > { %p1146_p11 = pnand %p1145_p8, %p1491_p9 }
 0x2f5   : > { %p1151_p5 = por %p1150_p0, %p1149_p1 }
 0x2f6   : > { %p1147_p13 = pneg %p1146_p11 }
 0x2f7   : > { %p1153_p10 = por %p1152_p6, %p1151_p5 }
 0x2f9   : > { %p1154_p12 = pnand %p1153_p10, %p1147_p13 }
 0x2fb   : > { %1157 = shalt.err (!%p1154_p12)
}
 0x2fc   : > { %1051 = dma.vmem_to_hbm [thread:$0]  (%p1491_p9), %s1435_s25, 16, %s1433_s6, %s634_s7  }
 0x2fd PF: > { %p1063_p2 = scmp.ge.s32.totalorder %s1196_s21, 2  ;;  %s658_s17 = sand.u32 1, %s1184_s18  }
 0x2fe   : > { %p1492_p3 = scmp.ne.s32.totalorder %s1485_s29, 0  ;;  %s659_s23 = scalar_lea.sflag [#allocation6], %s658_s17 }
 0x300   : > { %p1058_p4 = pnand %p1063_p2, %p1492_p3 }
 0x302   : > { %1179 = dma.done.wait (!%p1058_p4), %s659_s23, 16  }
 0x303   : > { %1181 = vsyncadd (!%p1058_p4), %s659_s23, 4294967280  ;;  %p16_p7 = scmp.ge.s32.totalorder %s1260_s24, 4   ;;  %s1493_s18 = smov %s1188_s19 }
 0x304   : > { %s1494_s19 = smov %s1192_s20  ;;  %s1495_s20 = smov %s1271_s27 }
 0x305   : > { %s1496_s21 = smov %s1260_s24  ;;  %18 = sbr.rel (!%p16_p7) target bundleno = 4 (0x4), region = 83 }
 0x30c   :  { %663 = vsyncpa [#allocation5], 1 }
 0x30d   :  { %665 = vsyncpa [#allocation5 + $0x1], 1 }
 0x30e   :  { %666 = vsyncpa [#allocation6], 1 }
 0x30f   :  { %668 = vsyncpa [#allocation6 + $0x1], 1 }

</bundles_post_ra>
